<compile_context>
chip_gen: v7x
topology: tpu7x:2x2x1
jax: 0.10.0
libtpu: 0.0.40
codegen_flags: <defaults>
</compile_context>

<pallas_src>
import jax
import jax.numpy as jnp
from jax.experimental import pallas as pl
from jax.experimental.pallas import tpu as pltpu


LANE = 128  # TPU lane width; hidden/matmul feature dims padded to this.


def _round_up(n: int, m: int) -> int:
    return ((n + m - 1) // m) * m


def _mlp_kernel(x_ref, w1_ref, b1_ref, w2_ref, b2_ref, wo_ref, bo_ref, o_ref):
    d_out = o_ref.shape[-1]
    # hidden layer 1 (f32 in, f32 MXU accumulation, bias + ReLU in f32)
    h = jnp.dot(x_ref[...], w1_ref[...], preferred_element_type=jnp.float32)
    h = jnp.maximum(h + b1_ref[...], 0.0)
    # hidden layer 2
    h = jnp.dot(h, w2_ref[...], preferred_element_type=jnp.float32)
    h = jnp.maximum(h + b2_ref[...], 0.0)
    # output layer (output_activation = Identity); Wout is lane-padded in VMEM,
    # only the true d_out columns are stored (narrow HBM writeback).
    y = jnp.dot(h, wo_ref[...], preferred_element_type=jnp.float32)
    o_ref[...] = (y[:, :d_out] + bo_ref[...]).astype(o_ref.dtype)


def prepare_params(params):
    """One-time parameter prep (pad hidden/matmul dims to lane multiples).

    params: (w1, b1, w2, b2, wo, bo) with weights stored as [in, out].
    Returns a tuple of arrays meant to be built ONCE and reused across calls.
    Zero padding is mathematically inert (zero weights + zero bias -> ReLU(0)=0).
    """
    w1, b1, w2, b2, wo, bo = params
    d_in, width = w1.shape
    d_out = wo.shape[1]
    width_p = _round_up(width, LANE)
    d_out_mm = _round_up(d_out, LANE)  # matmul-side padding only; HBM out stays d_out

    def pad2(a, rows, cols):
        return jnp.pad(a, ((0, rows - a.shape[0]), (0, cols - a.shape[1])))

    w1p = pad2(w1, d_in, width_p)          # [d_in, width_p]
    b1p = pad2(b1, 1, width_p)             # [1, width_p]
    w2p = pad2(w2, width_p, width_p)       # [width_p, width_p]
    b2p = pad2(b2, 1, width_p)             # [1, width_p]
    wop = pad2(wo, width_p, d_out_mm)      # [width_p, d_out_mm]
    bop = bo.reshape(1, d_out)             # [1, d_out] (unpadded; output is narrow)
    return (w1p, b1p, w2p, b2p, wop, bop)


def _choose_tm(n_rows: int, tm: int) -> int:
    tm = _round_up(max(tm, 8), 8)
    # Keep >=2 grid steps when possible so both v7x TensorCores get work
    # (dimension_semantics=("parallel",)).
    if tm >= n_rows:
        tm = _round_up(max(pl.cdiv(n_rows, 2), 8), 8)
    return tm


def mlp_forward(x, prepared, *, tm=2048):
    """Fused MLP forward (single pallas_call, weights resident in VMEM).

    x: [N, input_dim] float32.
    prepared: output of prepare_params() (built once, reused across calls).
    tm: row tile (sweepable; 2048-8192 amortizes per-grid-step overhead).
    """
    w1p, b1p, w2p, b2p, wop, bop = prepared
    N, d_in = x.shape
    assert d_in == w1p.shape[0], (d_in, w1p.shape)
    width_p = w1p.shape[1]
    d_out_mm = wop.shape[1]
    d_out = bop.shape[1]
    out_dtype = x.dtype

    tm = _choose_tm(N, tm)
    grid = (pl.cdiv(N, tm),)  # ragged edge block is masked; no row padding pass
    full = lambda i: (0, 0)   # weights/biases: same whole-array block each step

    flops = 2 * N * (d_in * width_p + width_p * width_p + width_p * d_out_mm)
    param_bytes = sum(int(a.size) * a.dtype.itemsize for a in prepared)
    bytes_accessed = (
        N * d_in * x.dtype.itemsize
        + N * d_out * jnp.dtype(out_dtype).itemsize
        + param_bytes
    )

    out = pl.pallas_call(
        _mlp_kernel,
        out_shape=jax.ShapeDtypeStruct((N, d_out), out_dtype),
        grid_spec=pl.GridSpec(
            grid=grid,
            in_specs=[
                pl.BlockSpec((tm, d_in), lambda i: (i, 0)),        # x row tile
                pl.BlockSpec((d_in, width_p), full),               # W1^T
                pl.BlockSpec((1, width_p), full),                  # b1
                pl.BlockSpec((width_p, width_p), full),            # W2^T
                pl.BlockSpec((1, width_p), full),                  # b2
                pl.BlockSpec((width_p, d_out_mm), full),           # Wout^T (lane-padded)
                pl.BlockSpec((1, d_out), full),                    # bout (true width)
            ],
            out_specs=pl.BlockSpec((tm, d_out), lambda i: (i, 0)),  # narrow output
        ),
        compiler_params=pltpu.CompilerParams(
            dimension_semantics=("parallel",),
        ),
        cost_estimate=pl.CostEstimate(
            flops=flops, transcendentals=0, bytes_accessed=bytes_accessed
        ),
    )(x, w1p, b1p, w2p, b2p, wop, bop)

    return out


def xavier_uniform(key, out_features, in_features, dtype=jnp.float32):
    """Matches torch.nn.init.xavier_uniform_ on a (out, in) weight matrix."""
    bound = (6.0 / (in_features + out_features)) ** 0.5
    return jax.random.uniform(
        key, (out_features, in_features), dtype=dtype, minval=-bound, maxval=bound
    )


def init_network_params(key, input_dim, output_dim, net_depth=2, net_width=64,
                        dtype=jnp.float32):
    """Deterministic init mirroring Network.__init__ / Network.initialize().

    hidden_init = xavier_uniform, output_init = xavier_uniform, bias_init = zeros.
    Weights are returned transposed ([in, out]) for the kernel's x @ W_t layout.
    """
    keys = jax.random.split(key, net_depth + 1)
    params = []
    in_features = input_dim
    for i in range(net_depth):
        w = xavier_uniform(keys[i], net_width, in_features, dtype)  # (out, in)
        b = jnp.zeros((1, net_width), dtype)
        params.append(w.T)  # store as (in, out)
        params.append(b)
        in_features = net_width
    wo = xavier_uniform(keys[net_depth], output_dim, in_features, dtype)
    bo = jnp.zeros((1, output_dim), dtype)
    params.append(wo.T)
    params.append(bo)
    return tuple(params)


def mlp_reference_f32(x, params):
    """Pure-JAX f32 reference of Network.forward."""
    w1, b1, w2, b2, wo, bo = params
    h = jnp.maximum(x @ w1 + b1, 0.0)
    h = jnp.maximum(h @ w2 + b2, 0.0)
    return h @ wo + bo


if __name__ == "__main__":
    key = jax.random.PRNGKey(0)
    k_x, k_p = jax.random.split(key)

    # Small shapes consistent with the module: net_depth=2, net_width=64.
    N, input_dim, output_dim = 128, 16, 8
    x = jax.random.normal(k_x, (N, input_dim), dtype=jnp.float32)
    params = init_network_params(k_p, input_dim, output_dim,
                                 net_depth=2, net_width=64)
    prepared = prepare_params(params)  # one-time param prep, reused across calls

    out = jax.block_until_ready(mlp_forward(x, prepared))
    assert out.shape == (N, output_dim), out.shape

    ref_f32 = mlp_reference_f32(x, params)
    assert jnp.allclose(out, ref_f32, atol=5e-2, rtol=5e-2), "mismatch vs f32 reference"

    # Exercise a non-tile-divisible row count (masked ragged edge block).
    N2 = 200
    x2 = jax.random.normal(jax.random.PRNGKey(1), (N2, input_dim), dtype=jnp.float32)
    out2 = jax.block_until_ready(mlp_forward(x2, prepared, tm=128))
    assert out2.shape == (N2, output_dim), out2.shape
    assert jnp.allclose(out2, mlp_reference_f32(x2, params), atol=5e-2, rtol=5e-2)

    print("KERNEL_OK")
</pallas_src>

<mosaic_0001>
module attributes {stable_mosaic.version = 11 : i64} {
  func.func @_mlp_kernel(%arg0: i32, %arg1: memref<64x16xf32, #tpu.memory_space<vmem>>, %arg2: memref<16x128xf32, #tpu.memory_space<vmem>>, %arg3: memref<1x128xf32, #tpu.memory_space<vmem>>, %arg4: memref<128x128xf32, #tpu.memory_space<vmem>>, %arg5: memref<1x128xf32, #tpu.memory_space<vmem>>, %arg6: memref<128x128xf32, #tpu.memory_space<vmem>>, %arg7: memref<1x8xf32, #tpu.memory_space<vmem>>, %arg8: memref<64x8xf32, #tpu.memory_space<vmem>>) attributes {dimension_semantics = [#tpu.dimension_semantics<parallel>], iteration_bounds = array<i64: 2>, scalar_prefetch = 0 : i64, scratch_operands = 0 : i64, tpu.core_type = #tpu.core_type<tc>, window_params = [{transform_indices = @transform_0, window_bounds = array<i64: 64, 16>}, {pipeline_mode = #tpu.pipeline_mode<synchronous>, transform_indices = @transform_1, window_bounds = array<i64: 16, 128>}, {pipeline_mode = #tpu.pipeline_mode<synchronous>, transform_indices = @transform_2, window_bounds = array<i64: 1, 128>}, {pipeline_mode = #tpu.pipeline_mode<synchronous>, transform_indices = @transform_3, window_bounds = array<i64: 128, 128>}, {pipeline_mode = #tpu.pipeline_mode<synchronous>, transform_indices = @transform_4, window_bounds = array<i64: 1, 128>}, {pipeline_mode = #tpu.pipeline_mode<synchronous>, transform_indices = @transform_5, window_bounds = array<i64: 128, 128>}, {pipeline_mode = #tpu.pipeline_mode<synchronous>, transform_indices = @transform_6, window_bounds = array<i64: 1, 8>}, {transform_indices = @transform_7, window_bounds = array<i64: 64, 8>}]} {
    %c0 = arith.constant 0 : index
    %c0_0 = arith.constant 0 : index
    %0 = vector.load %arg1[%c0, %c0_0] : memref<64x16xf32, #tpu.memory_space<vmem>>, vector<64x16xf32>
    %c0_1 = arith.constant 0 : index
    %c0_2 = arith.constant 0 : index
    %1 = vector.load %arg2[%c0_1, %c0_2] : memref<16x128xf32, #tpu.memory_space<vmem>>, vector<16x128xf32>
    %cst = arith.constant dense<0.000000e+00> : vector<64x128xf32>
    %2 = tpu.matmul %0, %1, %cst {dimension_numbers = #tpu.dot_dimension_numbers<[1], [0], [0], [1], [0, 0, 1, 1], [], []>} : vector<64x16xf32>, vector<16x128xf32>, vector<64x128xf32> -> vector<64x128xf32>
    %c0_3 = arith.constant 0 : index
    %c0_4 = arith.constant 0 : index
    %3 = vector.load %arg3[%c0_3, %c0_4] : memref<1x128xf32, #tpu.memory_space<vmem>>, vector<1x128xf32>
    %4 = vector.broadcast %3 : vector<1x128xf32> to vector<64x128xf32>
    %5 = arith.addf %2, %4 : vector<64x128xf32>
    %cst_5 = arith.constant 0.000000e+00 : f32
    %6 = vector.broadcast %cst_5 : f32 to vector<64x128xf32>
    %7 = arith.maximumf %5, %6 : vector<64x128xf32>
    %c0_6 = arith.constant 0 : index
    %c0_7 = arith.constant 0 : index
    %8 = vector.load %arg4[%c0_6, %c0_7] : memref<128x128xf32, #tpu.memory_space<vmem>>, vector<128x128xf32>
    %cst_8 = arith.constant dense<0.000000e+00> : vector<64x128xf32>
    %9 = tpu.matmul %7, %8, %cst_8 {dimension_numbers = #tpu.dot_dimension_numbers<[1], [0], [0], [1], [0, 0, 1, 1], [], []>} : vector<64x128xf32>, vector<128x128xf32>, vector<64x128xf32> -> vector<64x128xf32>
    %c0_9 = arith.constant 0 : index
    %c0_10 = arith.constant 0 : index
    %10 = vector.load %arg5[%c0_9, %c0_10] : memref<1x128xf32, #tpu.memory_space<vmem>>, vector<1x128xf32>
    %11 = vector.broadcast %10 : vector<1x128xf32> to vector<64x128xf32>
    %12 = arith.addf %9, %11 : vector<64x128xf32>
    %cst_11 = arith.constant 0.000000e+00 : f32
    %13 = vector.broadcast %cst_11 : f32 to vector<64x128xf32>
    %14 = arith.maximumf %12, %13 : vector<64x128xf32>
    %c0_12 = arith.constant 0 : index
    %c0_13 = arith.constant 0 : index
    %15 = vector.load %arg6[%c0_12, %c0_13] : memref<128x128xf32, #tpu.memory_space<vmem>>, vector<128x128xf32>
    %cst_14 = arith.constant dense<0.000000e+00> : vector<64x128xf32>
    %16 = tpu.matmul %14, %15, %cst_14 {dimension_numbers = #tpu.dot_dimension_numbers<[1], [0], [0], [1], [0, 0, 1, 1], [], []>} : vector<64x128xf32>, vector<128x128xf32>, vector<64x128xf32> -> vector<64x128xf32>
    %17 = vector.extract_strided_slice %16 {offsets = [0, 0], sizes = [64, 8], strides = [1, 1]} : vector<64x128xf32> to vector<64x8xf32>
    %c0_15 = arith.constant 0 : index
    %c0_16 = arith.constant 0 : index
    %18 = vector.load %arg7[%c0_15, %c0_16] : memref<1x8xf32, #tpu.memory_space<vmem>>, vector<1x8xf32>
    %19 = vector.broadcast %18 : vector<1x8xf32> to vector<64x8xf32>
    %20 = arith.addf %17, %19 : vector<64x8xf32>
    %c0_17 = arith.constant 0 : index
    %c0_18 = arith.constant 0 : index
    %21 = vector.load %arg8[%c0_17, %c0_18] : memref<64x8xf32, #tpu.memory_space<vmem>>, vector<64x8xf32>
    tpu.vector_store %arg8[%c0_17, %c0_18], %20 {strides = array<i32>} : memref<64x8xf32, #tpu.memory_space<vmem>>, vector<64x8xf32>,
    return
  }
  func.func @transform_0(%arg0: i32) -> (i32, i32) {
    %c0_i32 = arith.constant 0 : i32
    %c0_i32_0 = arith.constant 0 : i32
    return %arg0, %c0_i32 : i32, i32
  }
  func.func @transform_1(%arg0: i32) -> (i32, i32) {
    %c0_i32 = arith.constant 0 : i32
    %c0_i32_0 = arith.constant 0 : i32
    %c0_i32_1 = arith.constant 0 : i32
    return %c0_i32, %c0_i32_0 : i32, i32
  }
  func.func @transform_2(%arg0: i32) -> (i32, i32) {
    %c0_i32 = arith.constant 0 : i32
    %c0_i32_0 = arith.constant 0 : i32
    %c0_i32_1 = arith.constant 0 : i32
    return %c0_i32, %c0_i32_0 : i32, i32
  }
  func.func @transform_3(%arg0: i32) -> (i32, i32) {
    %c0_i32 = arith.constant 0 : i32
    %c0_i32_0 = arith.constant 0 : i32
    %c0_i32_1 = arith.constant 0 : i32
    return %c0_i32, %c0_i32_0 : i32, i32
  }
  func.func @transform_4(%arg0: i32) -> (i32, i32) {
    %c0_i32 = arith.constant 0 : i32
    %c0_i32_0 = arith.constant 0 : i32
    %c0_i32_1 = arith.constant 0 : i32
    return %c0_i32, %c0_i32_0 : i32, i32
  }
  func.func @transform_5(%arg0: i32) -> (i32, i32) {
    %c0_i32 = arith.constant 0 : i32
    %c0_i32_0 = arith.constant 0 : i32
    %c0_i32_1 = arith.constant 0 : i32
    return %c0_i32, %c0_i32_0 : i32, i32
  }
  func.func @transform_6(%arg0: i32) -> (i32, i32) {
    %c0_i32 = arith.constant 0 : i32
    %c0_i32_0 = arith.constant 0 : i32
    %c0_i32_1 = arith.constant 0 : i32
    return %c0_i32, %c0_i32_0 : i32, i32
  }
  func.func @transform_7(%arg0: i32) -> (i32, i32) {
    %c0_i32 = arith.constant 0 : i32
    %c0_i32_0 = arith.constant 0 : i32
    return %arg0, %c0_i32 : i32, i32
  }
}

</mosaic_0001>

<bundles_post_ra>
// kernel: tpu_custom_call.1
= control target key start
LH: loop header
LB: loop body
LE: loop exit
PB: predicated region body
PF: predicated region fallthrough
CT: control target
= control target key end

     0   :  { %12 = vsyncpa [#allocation3], 0  ;;  %s1159_s24 = smov 0   ;;  %s1314_s0 = inlined_call_operand.vmem [shape: f32[128,16], index: 0, kind: input, shape index: {}]   ;;  %s1315_s1 = inlined_call_operand.vmem [shape: f32[16,128], index: 1, kind: input, shape index: {}]   ;;  %s1316_s2 = inlined_call_operand.vmem [shape: f32[1,128], index: 2, kind: input, shape index: {}]   ;;  %s1317_s3 = inlined_call_operand.vmem [shape: f32[128,128], index: 3, kind: input, shape index: {}]   ;;  %s1318_s4 = inlined_call_operand.vmem [shape: f32[1,128], index: 4, kind: input, shape index: {}]   ;;  %s1319_s5 = inlined_call_operand.hbm [shape: f32[128,128], index: 5, kind: input, shape index: {}]   ;;  %s1320_s6 = inlined_call_operand.vmem [shape: f32[1,8], index: 6, kind: input, shape index: {}]   ;;  %s1321_s7 = inlined_call_operand.vmem [shape: f32[128,8], index: 7, kind: output, shape index: {}]  }
   0x1 LB: > { %s801_s25 = sadd.s32 4294967295, %s1114_s24   ;;  %p803_p0 = scmp.ge.s32.totalorder %s1114_s24, 1  ;;  %s1114_s24 = sphi %s1159_s24, %s18_s24  }
   0x2   : > { %p201_p1 = scmp.lt.s32.totalorder %s1114_s24, 3  ;;  %s1116_s26 = smov [#allocation2]  }
   0x3   : > { %s225_s27 = sshll.u32 %s1116_s26, 4  ;;  %p1173_p3 = scmp.eq.s32.totalorder %s801_s25, 0  ;;  %s226_s27 = int_to_ptr.vmem [resolvable:$true] %s225_s27 }
   0x4   : > { %p1167_p2 = pnand %p803_p0, %p201_p1  ;;  %s1076_s10 = scalar_lea.hbm %s1319_s5, 2048 }
   0x5   : > { %s1326_s29 = scalar_select %p1173_p3, 1, 0 }
   0x6   : > { %s1325_s28 = scalar_select %p1167_p2, 1, 0 }
   0x7   : > { %p1059_p4 = pneg %p1167_p2  ;;  %p1077_p6 = scmp.ne.s32.totalorder %s1319_s5, %s1076_s10 }
   0x8   : > { %p1083_p10 = scmp.lt.u32.totalorder %s1076_s10, %s1319_s5 }
   0x9   : > { %p1181_p5 = pnand %p1173_p3, %p1059_p4 }
   0xb   : > { %p1078_p7 = pneg %p1181_p5 }
   0xd   : > { %p1079_p8 = pnand %p1078_p7, %p1077_p6 }
   0xf   : > { %p1080_p9 = pneg %p1079_p8 }
  0x11   : > { %p1085_p11 = pnand %p1083_p10, %p1080_p9 }
  0x13   : > { %1088 = shalt.err (!%p1085_p11)
}
  0x14   : > { %s1089_s15 = scalar_lea.vmem %s226_s27, 2048  ;;  %p1097_p1 = scmp.lt.s32.totalorder %s226_s27, %s226_s27 }
  0x15   : > { %p1090_p12 = scmp.ne.s32.totalorder %s226_s27, %s1089_s15  ;;  %p1098_p4 = scmp.lt.s32.totalorder %s1089_s15, %s1089_s15 }
  0x17   : > { %p1092_p13 = pnand %p1090_p12, %p1078_p7  ;;  %p1099_p3 = por %p1098_p4, %p1097_p1 }
  0x19   : > { %p1093_p0 = pneg %p1092_p13 }
  0x1b   : > { %p1100_p2 = pnand %p1099_p3, %p1093_p0 }
  0x1d   : > { %1103 = shalt.err (!%p1100_p2)
}
  0x1e   : > { %s1117_s16 = smov 128   ;;  %s1118_s17 = smov 8  }
  0x1f   : > { %1062 = dma.hbm_to_vmem [thread:$0]  (!%p1181_p5), %s1319_s5, 2048, %s226_s27, [#allocation3], %s1117_s16, %s1117_s16, %s1118_s17  }
  0x20   : > { %p1328_p6 = scmp.ne.s32.totalorder %s1325_s28, 0 }
  0x21   : > { %p1329_p8 = scmp.ne.s32.totalorder (!%p1328_p6), %s1326_s29, 0 }
  0x22   : > { %253 = sbr.rel (%p1328_p6) target bundleno = 714 (0x2ca), region = 48 }
  0x29   : > { %1109 = dma.done.wait (%p1329_p8), [#allocation3], 2048  }
  0x2a   : > { %1111 = vsyncadd (%p1329_p8), [#allocation3], 4294965248  ;;  %s808_s20 = sshll.u32 %s801_s25, 3  ;;  %vm314_vm0 = vcmask 130048   ;;  %v305_v0 = vld [vmem:[%s1315_s1] sm:$0xff]  ;;  %v306_v1 = vld [vmem:[%s1315_s1 + $0x8] sm:$0xff] }
  0x2b   : > { %p286_p2 = scmp.lt.s32.totalorder %s808_s20, 15  ;;  %v987_v3 = vpack.c.bf16 %v306_v1, %v305_v0  ;;  %v452_v4 = vld [vmem:[%s1317_s3] sm:$0xff]  ;;  %v453_v5 = vld [vmem:[%s1317_s3 + $0x8] sm:$0xff]  ;;  %v454_v8 = vld [vmem:[%s1317_s3 + $0x10] sm:$0xff]  ;;  %vm724_vm1 = vcmask 64512  }
  0x2c   : > { %v991_v7 = vpack.c.bf16 %v453_v5, %v452_v4  ;;  %v455_v9 = vld [vmem:[%s1317_s3 + $0x18] sm:$0xff]  ;;  %v456_v12 = vld [vmem:[%s1317_s3 + $0x20] sm:$0xff]  ;;  %v457_v13 = vld [vmem:[%s1317_s3 + $0x28] sm:$0xff] }
  0x2d   : > { %s1331_s20 = smov (!%p286_p2, %s808_s20), 15  ;;  %988 = vmatprep.subr.bf16.mxu0 %v987_v3  ;;  %v995_v11 = vpack.c.bf16 %v455_v9, %v454_v8  ;;  %v999_v15 = vpack.c.bf16 %v457_v13, %v456_v12  ;;  %v458_v17 = vld [vmem:[%s1317_s3 + $0x30] sm:$0xff]  ;;  %v459_v18 = vld [vmem:[%s1317_s3 + $0x38] sm:$0xff]  ;;  %v460_v22 = vld [vmem:[%s1317_s3 + $0x40] sm:$0xff] }
  0x2e   : > { %s809_s21 = sshll.u32 %s1331_s20, 3  ;;  %990 = vmatpush3.bf16.msra.mxu0 %v987_v3  ;;  %992 = vmatprep.subr.bf16.mxu1 %v991_v7  ;;  %v1003_v20 = vpack.c.bf16 %v459_v18, %v458_v17  ;;  %v461_v23 = vld [vmem:[%s1317_s3 + $0x48] sm:$0xff]  ;;  %v462_v26 = vld [vmem:[%s1317_s3 + $0x50] sm:$0xff]  ;;  %v463_v27 = vld [vmem:[%s1317_s3 + $0x58] sm:$0xff] }
  0x2f   : > { %s1217_s26 = scalar_lea.vmem %s1314_s0, %s809_s21  ;;  %994 = vmatpush3.bf16.msra.mxu1 %v991_v7  ;;  %v1007_v25 = vpack.c.bf16 %v461_v23, %v460_v22  ;;  %v1011_v28 = vpack.c.bf16 %v463_v27, %v462_v26  ;;  %v464_v29 = vld [vmem:[%s1317_s3 + $0x60] sm:$0xff]  ;;  %v465_v30 = vld [vmem:[%s1317_s3 + $0x68] sm:$0xff]  ;;  %v466_v32 = vld [vmem:[%s1317_s3 + $0x70] sm:$0xff]  ;;  %s295_s8 = scalar_lea.vmem %s1321_s7, %s809_s21 }
  0x30   : > { %v297_v2 = vld [vmem:[%s1217_s26] sm:$0xff]  ;;  %v298_v6 = vld [vmem:[%s1217_s26 + $0x8] sm:$0xff]  ;;  %v299_v10 = vld [vmem:[%s1217_s26 + $0x10] sm:$0xff]  ;;  %996 = vmatprep.subr.bf16.mxu1 %v995_v11  ;;  %v1015_v31 = vpack.c.bf16 %v465_v30, %v464_v29 }
  0x31   : > { %887 = vmatprep.mubr.msk.f32.mxu0 %vm314_vm0, %v297_v2  ;;  %v300_v14 = vld [vmem:[%s1217_s26 + $0x18] sm:$0xff]  ;;  %v301_v16 = vld [vmem:[%s1217_s26 + $0x20] sm:$0xff]  ;;  %v302_v19 = vld [vmem:[%s1217_s26 + $0x28] sm:$0xff] }
  0x32   : > { %888 = vmatmul.mubr.msk.f32.vlgmr.msra.gmra.mrb[0].mxu0 %vm314_vm0, %v298_v6  ;;  %v303_v21 = vld [vmem:[%s1217_s26 + $0x30] sm:$0xff]  ;;  %v304_v24 = vld [vmem:[%s1217_s26 + $0x38] sm:$0xff]  ;;  %v588_v35 = vld [vmem:[#allocation2] sm:$0xff] }
  0x33   : > { %890 = vmatprep.mubr.msk.f32.mxu0 %vm314_vm0, %v299_v10  ;;  %998 = vmatpush3.bf16.msra.mxu1 %v995_v11  ;;  %v467_v33 = vld [vmem:[%s1317_s3 + $0x78] sm:$0xff]  ;;  %v589_v36 = vld [vmem:[#allocation2 + $0x8] sm:$0xff]  ;;  %v590_v37 = vld [vmem:[#allocation2 + $0x10] sm:$0xff] }
  0x34   : > { %1000 = vmatprep.subr.bf16.mxu1 %v999_v15  ;;  %v1019_v34 = vpack.c.bf16 %v467_v33, %v466_v32  ;;  %v1023_v38 = vpack.c.bf16 %v589_v36, %v588_v35  ;;  %v591_v39 = vld [vmem:[#allocation2 + $0x18] sm:$0xff]  ;;  %v592_v41 = vld [vmem:[#allocation2 + $0x20] sm:$0xff]  ;;  %v593_v42 = vld [vmem:[#allocation2 + $0x28] sm:$0xff] }
  0x35   : > { %v1027_v40 = vpack.c.bf16 %v591_v39, %v590_v37  ;;  %v1031_v43 = vpack.c.bf16 %v593_v42, %v592_v41  ;;  %v594_v44 = vld [vmem:[#allocation2 + $0x30] sm:$0xff]  ;;  %v595_v45 = vld [vmem:[#allocation2 + $0x38] sm:$0xff]  ;;  %v596_v47 = vld [vmem:[#allocation2 + $0x40] sm:$0xff] }
  0x36   : > { %891 = vmatmul.mubr.msk.f32.gmra.mrb[2].mxu0 %vm314_vm0, %v300_v14  ;;  %1024 = vmatprep.subr.bf16.mxu0 %v1023_v38  ;;  %v1035_v46 = vpack.c.bf16 %v595_v45, %v594_v44  ;;  %v597_v48 = vld [vmem:[#allocation2 + $0x48] sm:$0xff]  ;;  %v598_v50 = vld [vmem:[#allocation2 + $0x50] sm:$0xff]  ;;  %v599_v51 = vld [vmem:[#allocation2 + $0x58] sm:$0xff] }
  0x37   : > { %893 = vmatprep.mubr.msk.f32.mxu0 %vm314_vm0, %v301_v16  ;;  %1002 = vmatpush3.bf16.msra.mxu1 %v999_v15  ;;  %v1039_v49 = vpack.c.bf16 %v597_v48, %v596_v47  ;;  %v1043_v52 = vpack.c.bf16 %v599_v51, %v598_v50  ;;  %v600_v53 = vld [vmem:[#allocation2 + $0x60] sm:$0xff]  ;;  %v601_v54 = vld [vmem:[#allocation2 + $0x68] sm:$0xff]  ;;  %v602_v17 = vld [vmem:[#allocation2 + $0x70] sm:$0xff] }
  0x38   : > { %1004 = vmatprep.subr.bf16.mxu1 %v1003_v20  ;;  %1026 = vmatpush3.bf16.msra.mxu0 %v1023_v38  ;;  %v1047_v55 = vpack.c.bf16 %v601_v54, %v600_v53  ;;  %v812_v56 = vld [vmem:[%s1316_s2] ss:$0 sm:$0xff]  ;;  %v603_v18 = vld [vmem:[#allocation2 + $0x78] sm:$0xff] }
  0x39   : > { %1028 = vmatprep.subr.bf16.mxu0 %v1027_v40  ;;  %v822_v45 = vld [vmem:[%s1320_s6] ss:$0 sm:$0xff] }
  0x3a   : > { %894 = vmatmul.mubr.msk.f32.gmra.mrb[4].mxu0 %vm314_vm0, %v302_v19  ;;  %v1051_v19 = vpack.c.bf16 %v603_v18, %v602_v17 }
  0x3b   : > { %896 = vmatprep.mubr.msk.f32.mxu0 %vm314_vm0, %v303_v21  ;;  %1006 = vmatpush3.bf16.msra.mxu1 %v1003_v20  ;;  %v821_v20 = vld [vmem:[%s1318_s4] ss:$0 sm:$0xff] }
  0x3c   : > { %1008 = vmatprep.subr.bf16.mxu1 %v1007_v25  ;;  %1030 = vmatpush3.bf16.msra.mxu0 %v1027_v40 }
  0x3d   : > { %1032 = vmatprep.subr.bf16.mxu0 %v1031_v43 }
  0x3e   : > { %897 = vmatmul.mubr.msk.f32.gmra.mrb[6].mxu0 %vm314_vm0, %v304_v24 }
  0x3f   : > { %1010 = vmatpush3.bf16.msra.mxu1 %v1007_v25 }
  0x40   : > { %1012 = vmatprep.subr.bf16.mxu1 %v1011_v28  ;;  %1034 = vmatpush3.bf16.msra.mxu0 %v1031_v43 }
  0x41   : > { %1036 = vmatprep.subr.bf16.mxu0 %v1035_v46 }
  0x43   : > { %1014 = vmatpush3.bf16.msra.mxu1 %v1011_v28 }
  0x44   : > { %1016 = vmatprep.subr.bf16.mxu1 %v1015_v31  ;;  %1038 = vmatpush3.bf16.msra.mxu0 %v1035_v46 }
  0x45   : > { %1040 = vmatprep.subr.bf16.mxu0 %v1039_v49 }
  0x47   : > { %1018 = vmatpush3.bf16.msra.mxu1 %v1015_v31 }
  0x48   : > { %1020 = vmatprep.subr.bf16.mxu1 %v1019_v34  ;;  %1042 = vmatpush3.bf16.msra.mxu0 %v1039_v49 }
  0x49   : > { %1044 = vmatprep.subr.bf16.mxu0 %v1043_v52 }
  0x4b   : > { %1022 = vmatpush3.bf16.msra.mxu1 %v1019_v34 }
  0x4c   : > { %1046 = vmatpush3.bf16.msra.mxu0 %v1043_v52 }
  0x4d   : > { %1048 = vmatprep.subr.bf16.mxu0 %v1047_v55 }
  0x50   : > { %1050 = vmatpush3.bf16.msra.mxu0 %v1047_v55 }
  0x51   : > { %1052 = vmatprep.subr.bf16.mxu0 %v1051_v19 }
  0x54   : > { %1054 = vmatpush3.bf16.msra.mxu0 %v1051_v19 }
 0x105   : > { %v889_v57 = vpop.f32.mrb[0].mxu0 }
 0x106   : > { %v411_v58 = vadd.f32 %v889_v57, %v812_v56  ;;  %v405_v59 = vpop.f32.mrb[1].mxu0 }
 0x107   : > { %v406_v60 = vadd.f32 %v812_v56, %v405_v59 }
 0x108   : > { %v445_v63 = vmax.f32 %v411_v58, 0.0 }
 0x109   : > { %v892_v61 = vpop.f32.mrb[2].mxu0  ;;  %v444_v62 = vmax.f32 %v406_v60, 0.0 }
 0x10a   : > { %v421_v0 = vadd.f32 %v892_v61, %v812_v56  ;;  %v415_v1 = vpop.f32.mrb[3].mxu0 }
 0x10b   : > { %v416_v2 = vadd.f32 %v812_v56, %v415_v1  ;;  %931 = vmatprep.mubr.f32.mxu1 %v444_v62 }
 0x10c   : > { %932 = vmatmul.mubr.f32.vlgmr.msra.gmra.mrb[0].mxu1 %v445_v63  ;;  %v447_v5 = vmax.f32 %v421_v0, 0.0 }
 0x10d   : > { %v446_v3 = vmax.f32 %v416_v2, 0.0  ;;  %v895_v4 = vpop.f32.mrb[4].mxu0 }
 0x10e   : > { %v431_v6 = vadd.f32 %v895_v4, %v812_v56  ;;  %v425_v7 = vpop.f32.mrb[5].mxu0 }
 0x10f   : > { %v426_v8 = vadd.f32 %v812_v56, %v425_v7  ;;  %934 = vmatprep.mubr.f32.mxu1 %v446_v3 }
 0x110   : > { %935 = vmatmul.mubr.f32.gmra.mrb[2].mxu1 %v447_v5  ;;  %v449_v11 = vmax.f32 %v431_v6, 0.0 }
 0x111   : > { %v448_v9 = vmax.f32 %v426_v8, 0.0  ;;  %v898_v10 = vpop.f32.mrb[6].mxu0 }
 0x112   : > { %v441_v12 = vadd.f32 %v898_v10, %v812_v56  ;;  %v435_v13 = vpop.f32.mrb[7].mxu0 }
 0x113   : > { %v436_v14 = vadd.f32 %v812_v56, %v435_v13  ;;  %937 = vmatprep.mubr.f32.mxu1 %v448_v9 }
 0x114   : > { %938 = vmatmul.mubr.f32.gmra.mrb[4].mxu1 %v449_v11  ;;  %v451_v16 = vmax.f32 %v441_v12, 0.0 }
 0x115   : > { %v450_v15 = vmax.f32 %v436_v14, 0.0 }
 0x117   : > { %940 = vmatprep.mubr.f32.mxu1 %v450_v15 }
 0x118   : > { %941 = vmatmul.mubr.f32.gmra.mrb[6].mxu1 %v451_v16 }
 0x1df   : > { %v933_v21 = vpop.f32.mrb[0].mxu1 }
 0x1e0   : > { %v547_v22 = vadd.f32 %v933_v21, %v821_v20  ;;  %v541_v23 = vpop.f32.mrb[1].mxu1 }
 0x1e1   : > { %v542_v24 = vadd.f32 %v821_v20, %v541_v23 }
 0x1e2   : > { %v581_v27 = vmax.f32 %v547_v22, 0.0 }
 0x1e3   : > { %v580_v25 = vmax.f32 %v542_v24, 0.0  ;;  %v936_v26 = vpop.f32.mrb[2].mxu1 }
 0x1e4   : > { %v557_v28 = vadd.f32 %v936_v26, %v821_v20  ;;  %v551_v29 = vpop.f32.mrb[3].mxu1 }
 0x1e5   : > { %v552_v30 = vadd.f32 %v821_v20, %v551_v29  ;;  %975 = vmatprep.mubr.f32.mxu0 %v580_v25 }
 0x1e6   : > { %976 = vmatmul.mubr.f32.vlgmr.msra.gmra.mrb[8].mxu0 %v581_v27  ;;  %v583_v33 = vmax.f32 %v557_v28, 0.0 }
 0x1e7   : > { %v582_v31 = vmax.f32 %v552_v30, 0.0  ;;  %v939_v32 = vpop.f32.mrb[4].mxu1 }
 0x1e8   : > { %v567_v34 = vadd.f32 %v939_v32, %v821_v20  ;;  %v561_v35 = vpop.f32.mrb[5].mxu1 }
 0x1e9   : > { %v562_v36 = vadd.f32 %v821_v20, %v561_v35  ;;  %978 = vmatprep.mubr.f32.mxu0 %v582_v31 }
 0x1ea   : > { %979 = vmatmul.mubr.f32.gmra.mrb[10].mxu0 %v583_v33  ;;  %v585_v39 = vmax.f32 %v567_v34, 0.0 }
 0x1eb   : > { %v584_v37 = vmax.f32 %v562_v36, 0.0  ;;  %v942_v38 = vpop.f32.mrb[6].mxu1 }
 0x1ec   : > { %v577_v40 = vadd.f32 %v942_v38, %v821_v20  ;;  %v571_v41 = vpop.f32.mrb[7].mxu1 }
 0x1ed   : > { %v572_v42 = vadd.f32 %v821_v20, %v571_v41  ;;  %981 = vmatprep.mubr.f32.mxu0 %v584_v37 }
 0x1ee   : > { %982 = vmatmul.mubr.f32.gmra.mrb[12].mxu0 %v585_v39  ;;  %v587_v44 = vmax.f32 %v577_v40, 0.0 }
 0x1ef   : > { %v586_v43 = vmax.f32 %v572_v42, 0.0 }
 0x1f1   : > { %984 = vmatprep.mubr.f32.mxu0 %v586_v43 }
 0x1f2   : > { %985 = vmatmul.mubr.f32.gmra.mrb[14].mxu0 %v587_v44 }
 0x2b9   : > { %v977_v46 = vpop.f32.mrb[8].mxu0 }
 0x2ba   : > { %v717_v47 = vadd.f32 %v977_v46, %v822_v45  ;;  %v670_v48 = vpop.f32.mrb[9].mxu0 }
 0x2bb   : > { %v716_v49 = vadd.f32 %v822_v45, %v670_v48 }
 0x2bc   : > { %726 = vst.msk [vmem:[%s295_s8 + $0x8] sm:$0xff] %vm724_vm1, %v717_v47 }
 0x2bd   : > { %725 = vst.msk [vmem:[%s295_s8] sm:$0xff] %vm724_vm1, %v716_v49  ;;  %v980_v50 = vpop.f32.mrb[10].mxu0 }
 0x2be   : > { %v719_v51 = vadd.f32 %v980_v50, %v822_v45  ;;  %v680_v52 = vpop.f32.mrb[11].mxu0 }
 0x2bf   : > { %v718_v53 = vadd.f32 %v822_v45, %v680_v52 }
 0x2c0   : > { %728 = vst.msk [vmem:[%s295_s8 + $0x18] sm:$0xff] %vm724_vm1, %v719_v51 }
 0x2c1   : > { %727 = vst.msk [vmem:[%s295_s8 + $0x10] sm:$0xff] %vm724_vm1, %v718_v53  ;;  %v983_v54 = vpop.f32.mrb[12].mxu0 }
 0x2c2   : > { %v721_v55 = vadd.f32 %v983_v54, %v822_v45  ;;  %v690_v56 = vpop.f32.mrb[13].mxu0 }
 0x2c3   : > { %v720_v57 = vadd.f32 %v822_v45, %v690_v56 }
 0x2c4   : > { %730 = vst.msk [vmem:[%s295_s8 + $0x28] sm:$0xff] %vm724_vm1, %v721_v55 }
 0x2c5   : > { %729 = vst.msk [vmem:[%s295_s8 + $0x20] sm:$0xff] %vm724_vm1, %v720_v57  ;;  %v986_v58 = vpop.f32.mrb[14].mxu0 }
 0x2c6   : > { %v723_v59 = vadd.f32 %v986_v58, %v822_v45  ;;  %v700_v60 = vpop.f32.mrb[15].mxu0 }
 0x2c7   : > { %v722_v61 = vadd.f32 %v822_v45, %v700_v60 }
 0x2c8   : > { %732 = vst.msk [vmem:[%s295_s8 + $0x38] sm:$0xff] %vm724_vm1, %v723_v59 }
 0x2c9   : > { %731 = vst.msk [vmem:[%s295_s8 + $0x30] sm:$0xff] %vm724_vm1, %v722_v61 }
 0x2ca PF: > { %s18_s24 = sadd.s32 1, %s1114_s24  }
 0x2cb   : > { %p15_p3 = scmp.ge.s32.totalorder %s18_s24, 4  }
 0x2cd   :  { %17 = sbr.rel (!%p15_p3) target bundleno = 1 (0x1), region = 83 }
 0x2d4   :  { %755 = vsyncpa [#allocation3], 1 }
 0x2d5   :  { %757 = vsyncpa [#allocation3 + $0x1], 1 }

</bundles_post_ra>
